<compile_context>
chip_gen: v7x
topology: tpu7x:2x2x1
jax: 0.10.0
libtpu: 0.0.40
codegen_flags: <defaults>
</compile_context>

<pallas_src>
import numpy as np
import jax
import jax.numpy as jnp
from jax.experimental import pallas as pl
from jax.experimental.pallas import tpu as pltpu


# ----------------------------------------------------------------------------- #
# Pallas kernel: single streaming pass over the logits.
# Per row: argmax index, sum_v log_softmax, sum_v cs[v]*log_softmax,
#          log_softmax at the target column.
# ----------------------------------------------------------------------------- #
def _stats_kernel(x_ref, tgt_ref, cs_ref, pred_ref, slp_ref, dlp_ref, tlp_ref):
    x = x_ref[...].astype(jnp.float32)                      # (tm, V)
    tm, V = x.shape
    cols = jax.lax.broadcasted_iota(jnp.int32, (tm, V), 1)

    m = jnp.max(x, axis=-1, keepdims=True)                  # (tm, 1)
    pred_ref[...] = jnp.min(jnp.where(x == m, cols, V), axis=-1,
                            keepdims=True).astype(jnp.int32)

    lse = m + jnp.log(jnp.sum(jnp.exp(x - m), axis=-1, keepdims=True))
    logp = x - lse                                          # log_softmax(x)

    slp_ref[...] = jnp.sum(logp, axis=-1, keepdims=True)                    # sum_v logp
    dlp_ref[...] = jnp.sum(logp * cs_ref[...], axis=-1, keepdims=True)      # sum_v cs*logp
    tlp_ref[...] = jnp.sum(jnp.where(cols == tgt_ref[...], logp, 0.0),
                           axis=-1, keepdims=True)                          # logp[target]


# ----------------------------------------------------------------------------- #
# Tile sizing / VMEM helpers
# ----------------------------------------------------------------------------- #
def _vmem_capacity_bytes():
    try:
        return int(pltpu.get_tpu_info().vmem_capacity_bytes)
    except Exception:
        return 64 * 2 ** 20  # conservative default (v7x per-TC VMEM)


def _pick_tm(N, V, itemsize):
    """Largest row tile that comfortably fits VMEM on this TPU generation."""
    vmem = _vmem_capacity_bytes()
    # per-row VMEM cost: double-buffered input block + ~6 f32 (tm, V) temporaries
    per_row = 2 * V * itemsize + 6 * V * 4
    cap = int(0.5 * vmem) // max(1, per_row)
    cap = max(16, min(512, (cap // 16) * 16))     # multiple of 16 (bf16-safe)
    n_pad = ((N + 15) // 16) * 16
    # TODO(synk): for very large vocab (V >= ~64k) add a vocab grid axis with an
    # online max/LSE scheme instead of requiring a full (tm, V) row block.
    return max(16, min(cap, n_pad))


def _compiler_params():
    return pltpu.CompilerParams(
        dimension_semantics=("parallel",),
        vmem_limit_bytes=int(0.85 * _vmem_capacity_bytes()),
    )


# ----------------------------------------------------------------------------- #
# Pallas wrapper
# ----------------------------------------------------------------------------- #
def logits_stats_pallas(x, target_col, cs_scaled, tm):
    """x: (N, V) logits.  target_col: (N, 1) int32.  cs_scaled: (V,) cls_smooth/(V-1)."""
    N, V = x.shape
    pad = (-N) % tm
    if pad:
        x = jnp.pad(x, ((0, pad), (0, 0)))
        target_col = jnp.pad(target_col, ((0, pad), (0, 0)))
    Np = N + pad
    cs2 = jnp.asarray(cs_scaled, jnp.float32).reshape(1, V)

    pred, slp, dlp, tlp = pl.pallas_call(
        _stats_kernel,
        out_shape=(jax.ShapeDtypeStruct((Np, 1), jnp.int32),
                   jax.ShapeDtypeStruct((Np, 1), jnp.float32),
                   jax.ShapeDtypeStruct((Np, 1), jnp.float32),
                   jax.ShapeDtypeStruct((Np, 1), jnp.float32)),
        grid=(Np // tm,),
        in_specs=[
            pl.BlockSpec((tm, V), lambda i: (i, 0)),
            pl.BlockSpec((tm, 1), lambda i: (i, 0)),
            pl.BlockSpec((1, V), lambda i: (0, 0)),     # constant block, fetched once
        ],
        out_specs=tuple(pl.BlockSpec((tm, 1), lambda i: (i, 0)) for _ in range(4)),
        compiler_params=_compiler_params(),
    )(x, target_col, cs2)
    return pred[:N, 0], slp[:N, 0], dlp[:N, 0], tlp[:N, 0]


# ----------------------------------------------------------------------------- #
# Host-side glue (replicates the data-dependent Python loop of the PyTorch code)
# ----------------------------------------------------------------------------- #
def edit_distance(a, b):
    # Levenshtein distance (== ed.eval in the original module)
    m, n = len(a), len(b)
    dp = list(range(n + 1))
    for i in range(1, m + 1):
        prev, dp[0] = dp[0], i
        for j in range(1, n + 1):
            cur = dp[j]
            dp[j] = min(dp[j] + 1, dp[j - 1] + 1, prev + (a[i - 1] != b[j - 1]))
            prev = cur
    return dp[n]


def _xlogy0(v):
    v = np.asarray(v, np.float64)
    return np.where(v > 0.0, v * np.log(np.where(v > 0.0, v, 1.0)), 0.0)


def combine_rows(t_f, p_f, slp, dlp, tlp, alpha, cs, head_cls, V):
    """Per-row KL sums for the filtered (non-padding) rows, via the exact
    closed-form decomposition of KLDiv(log_softmax, true_dist)."""
    # TODO(synk): segmentation + edit distance are inherently data-dependent
    # host-side scalar work (the PyTorch code also uses .tolist()); kept as glue.
    n = t_f.shape[0]
    S_cs = float(np.sum(cs))
    head_set = set(int(c) for c in head_cls)

    sm = np.zeros(n, np.float64)      # example_smoothing / (V-1)
    hd = np.zeros(n, np.float64)      # head-class flag
    xl0 = np.zeros(n, np.float64)     # sum_v xlogy(true_dist before scatter)

    i = 0
    for j in np.nonzero(t_f == 3)[0]:
        j = int(j)
        if i < j:                     # v4: only non-empty segments
            d = edit_distance(list(t_f[i:j]), list(p_f[i:j]))
            beta = d / float(j - i)                       # CER
            ex = 1.0 - (1.0 - beta) ** alpha              # v4 example smoothing
            sm_seg = ex / (V - 1)
            xl_nohead = float(V * _xlogy0(sm_seg))
            xl_head = float(np.sum(_xlogy0(sm_seg + cs)))
            for t in range(i, j):
                is_head = int(t_f[t]) in head_set
                sm[t] = sm_seg
                hd[t] = 1.0 if is_head else 0.0
                xl0[t] = xl_head if is_head else xl_nohead
        i = j + 1

    cs_t = cs[t_f]                              # cs at the target column, per row
    td0_t = sm + hd * cs_t                      # true_dist at target col before scatter
    conf = 1.0 - (V * sm + hd * S_cs)           # confidence scattered at target col
    XL = xl0 - _xlogy0(td0_t) + _xlogy0(conf)
    CROSS = sm * slp + hd * dlp + (conf - td0_t) * tlp
    return XL - CROSS                           # per-row KL sums


def class_aware_label_smoothing_v4(logits, target, *, alpha, cls_smooth, head_cls,
                                   padding_idx=0, normalize_length=True):
    B = logits.shape[0]
    V = logits.shape[-1]
    x = logits.reshape(-1, V)                       # keep native dtype (bf16-friendly)
    tflat = target.reshape(-1).astype(jnp.int32)
    N = x.shape[0]
    tm = _pick_tm(N, V, jnp.dtype(x.dtype).itemsize)

    cs = np.asarray(cls_smooth, np.float64) / float(V - 1)   # cls_smooth / (V-1)

    # Single Pallas streaming pass over the logits.
    pred, slp, dlp, tlp = logits_stats_pallas(
        x, tflat.reshape(-1, 1), cs.astype(np.float32), tm)
    pred_np, slp_np, dlp_np, tlp_np, tgt_np = jax.device_get((pred, slp, dlp, tlp, tflat))

    # Filter padding rows (matches the PyTorch index select).
    tgt_np = np.asarray(tgt_np)
    keep = np.nonzero(tgt_np != padding_idx)[0]
    t_f = tgt_np[keep]
    p_f = np.asarray(pred_np)[keep]

    kl_rows = combine_rows(
        t_f, p_f,
        np.asarray(slp_np, np.float64)[keep],
        np.asarray(dlp_np, np.float64)[keep],
        np.asarray(tlp_np, np.float64)[keep],
        alpha, cs, head_cls, V)

    denom = float(len(t_f)) if normalize_length else float(B)
    return jnp.asarray(float(np.sum(kl_rows)) / denom, jnp.float32)


# ----------------------------------------------------------------------------- #
# Pure NumPy reference (mirrors the PyTorch v4 forward)
# ----------------------------------------------------------------------------- #
def reference_numpy(logits, target, alpha, cls_smooth, head_cls, padding_idx=0,
                    normalize_length=True):
    B = logits.shape[0]
    V = logits.shape[-1]
    x = np.asarray(logits, np.float64).reshape(-1, V)
    t = np.asarray(target).reshape(-1)
    keep = np.nonzero(t != padding_idx)[0]
    x = x[keep]
    t = t[keep]
    e = np.exp(x - x.max(-1, keepdims=True))
    p = e / e.sum(-1, keepdims=True)
    pred = p.argmax(-1)
    smoothing = np.zeros_like(x)
    head_set = set(int(c) for c in head_cls)
    i = 0
    for j in np.nonzero(t == 3)[0]:
        j = int(j)
        if i < j:
            d = edit_distance(list(t[i:j]), list(pred[i:j]))
            beta = d / float(j - i)
            ex = 1.0 - (1.0 - beta) ** alpha
            seg = np.full((j - i, V), ex, np.float64)
            for tt in range(j - i):
                if int(t[i + tt]) in head_set:
                    seg[tt] += np.asarray(cls_smooth, np.float64)
            smoothing[i:j] = seg
        i = j + 1
    true_dist = smoothing / (V - 1)
    conf = 1.0 - true_dist.sum(-1)
    true_dist[np.arange(len(t)), t] = conf
    logp = x - x.max(-1, keepdims=True)
    logp = logp - np.log(np.exp(logp).sum(-1, keepdims=True))
    # xlogy convention (0*log0 = 0), matching torch KLDivLoss zero-target handling
    xlogy = np.where(true_dist > 0,
                     true_dist * np.log(np.where(true_dist > 0, true_dist, 1.0)), 0.0)
    kl = xlogy - true_dist * logp
    denom = len(t) if normalize_length else B
    return float(kl.sum() / denom)


# ----------------------------------------------------------------------------- #
if __name__ == "__main__":
    B, T, V = 2, 8, 32
    key = jax.random.PRNGKey(0)
    k1, k2 = jax.random.split(key)
    logits = jax.random.normal(k1, (B, T, V), jnp.float32)
    target = jax.random.randint(k2, (B, T), 4, V).astype(jnp.int32)
    # inject padding (0) and sentence-end (3) tokens deterministically
    target = target.at[0, 3].set(3).at[0, 7].set(0).at[1, 0].set(0).at[1, 5].set(3)

    # deterministic module "parameters"
    ignore_index = 0
    alpha = 0.1
    smooth_tail = 0.01
    cls_num_list = np.arange(V, dtype=np.float64) * 7.0 + 3.0      # len == vocab
    head_cls = [4, 5, 6, 7, 8]
    cls_smooth = (smooth_tail + (0.05 - smooth_tail)
                  * (cls_num_list - cls_num_list.min())
                  / (cls_num_list.max() - cls_num_list.min())).astype(np.float32)

    loss = class_aware_label_smoothing_v4(
        logits, target, alpha=alpha, cls_smooth=cls_smooth, head_cls=head_cls,
        padding_idx=ignore_index, normalize_length=True)
    loss = jax.block_until_ready(loss)

    ref = reference_numpy(np.asarray(logits), np.asarray(target), alpha,
                          cls_smooth, head_cls, padding_idx=ignore_index,
                          normalize_length=True)

    assert np.isfinite(float(loss))
    assert abs(float(loss) - ref) <= 1e-3 * max(1.0, abs(ref)), (float(loss), ref)
    print("KERNEL_OK")
</pallas_src>

<mosaic_0001>
module attributes {stable_mosaic.version = 11 : i64} {
  func.func @_stats_kernel(%arg0: i32, %arg1: memref<16x32xf32, #tpu.memory_space<vmem>>, %arg2: memref<16x1xi32, #tpu.memory_space<vmem>>, %arg3: memref<1x32xf32, #tpu.memory_space<vmem>>, %arg4: memref<16x1xi32, #tpu.memory_space<vmem>>, %arg5: memref<16x1xf32, #tpu.memory_space<vmem>>, %arg6: memref<16x1xf32, #tpu.memory_space<vmem>>, %arg7: memref<16x1xf32, #tpu.memory_space<vmem>>) attributes {dimension_semantics = [#tpu.dimension_semantics<parallel>], iteration_bounds = array<i64: 1>, scalar_prefetch = 0 : i64, scratch_operands = 0 : i64, tpu.core_type = #tpu.core_type<tc>, window_params = [{transform_indices = @transform_0, window_bounds = array<i64: 16, 32>}, {transform_indices = @transform_1, window_bounds = array<i64: 16, 1>}, {pipeline_mode = #tpu.pipeline_mode<synchronous>, transform_indices = @transform_2, window_bounds = array<i64: 1, 32>}, {transform_indices = @transform_3, window_bounds = array<i64: 16, 1>}, {transform_indices = @transform_4, window_bounds = array<i64: 16, 1>}, {transform_indices = @transform_5, window_bounds = array<i64: 16, 1>}, {transform_indices = @transform_6, window_bounds = array<i64: 16, 1>}]} {
    %c0 = arith.constant 0 : index
    %c0_0 = arith.constant 0 : index
    %0 = vector.load %arg1[%c0, %c0_0] : memref<16x32xf32, #tpu.memory_space<vmem>>, vector<16x32xf32>
    %1 = tpu.iota {dimensions = array<i32: 1>} : vector<16x32xi32>
    %cst = arith.constant dense<0xFF800000> : vector<16xf32>
    %2 = vector.multi_reduction <maximumf>, %0, %cst [1] : vector<16x32xf32> to vector<16xf32>
    %3 = vector.shape_cast %2 : vector<16xf32> to vector<16x1xf32>
    %4 = vector.broadcast %3 : vector<16x1xf32> to vector<16x32xf32>
    %5 = arith.cmpf oeq, %0, %4 : vector<16x32xf32>
    %c32_i32 = arith.constant 32 : i32
    %6 = vector.broadcast %c32_i32 : i32 to vector<16x32xi32>
    %7 = arith.select %5, %1, %6 : vector<16x32xi1>, vector<16x32xi32>
    %cst_1 = arith.constant dense<2147483647> : vector<16xi32>
    %8 = vector.multi_reduction <minsi>, %7, %cst_1 [1] : vector<16x32xi32> to vector<16xi32>
    %9 = vector.shape_cast %8 : vector<16xi32> to vector<16x1xi32>
    %c0_2 = arith.constant 0 : index
    %c0_3 = arith.constant 0 : index
    %10 = vector.load %arg4[%c0_2, %c0_3] : memref<16x1xi32, #tpu.memory_space<vmem>>, vector<16x1xi32>
    tpu.vector_store %arg4[%c0_2, %c0_3], %9 {strides = array<i32>} : memref<16x1xi32, #tpu.memory_space<vmem>>, vector<16x1xi32>,
    %11 = vector.broadcast %3 : vector<16x1xf32> to vector<16x32xf32>
    %12 = arith.subf %0, %11 : vector<16x32xf32>
    %13 = math.exp %12 : vector<16x32xf32>
    %cst_4 = arith.constant dense<0.000000e+00> : vector<16xf32>
    %14 = vector.multi_reduction <add>, %13, %cst_4 [1] : vector<16x32xf32> to vector<16xf32>
    %15 = vector.shape_cast %14 : vector<16xf32> to vector<16x1xf32>
    %16 = math.log %15 : vector<16x1xf32>
    %17 = arith.addf %3, %16 : vector<16x1xf32>
    %18 = vector.broadcast %17 : vector<16x1xf32> to vector<16x32xf32>
    %19 = arith.subf %0, %18 : vector<16x32xf32>
    %cst_5 = arith.constant dense<0.000000e+00> : vector<16xf32>
    %20 = vector.multi_reduction <add>, %19, %cst_5 [1] : vector<16x32xf32> to vector<16xf32>
    %21 = vector.shape_cast %20 : vector<16xf32> to vector<16x1xf32>
    %c0_6 = arith.constant 0 : index
    %c0_7 = arith.constant 0 : index
    %22 = vector.load %arg5[%c0_6, %c0_7] : memref<16x1xf32, #tpu.memory_space<vmem>>, vector<16x1xf32>
    tpu.vector_store %arg5[%c0_6, %c0_7], %21 {strides = array<i32>} : memref<16x1xf32, #tpu.memory_space<vmem>>, vector<16x1xf32>,
    %c0_8 = arith.constant 0 : index
    %c0_9 = arith.constant 0 : index
    %23 = vector.load %arg3[%c0_8, %c0_9] : memref<1x32xf32, #tpu.memory_space<vmem>>, vector<1x32xf32>
    %24 = vector.broadcast %23 : vector<1x32xf32> to vector<16x32xf32>
    %25 = arith.mulf %19, %24 : vector<16x32xf32>
    %cst_10 = arith.constant dense<0.000000e+00> : vector<16xf32>
    %26 = vector.multi_reduction <add>, %25, %cst_10 [1] : vector<16x32xf32> to vector<16xf32>
    %27 = vector.shape_cast %26 : vector<16xf32> to vector<16x1xf32>
    %c0_11 = arith.constant 0 : index
    %c0_12 = arith.constant 0 : index
    %28 = vector.load %arg6[%c0_11, %c0_12] : memref<16x1xf32, #tpu.memory_space<vmem>>, vector<16x1xf32>
    tpu.vector_store %arg6[%c0_11, %c0_12], %27 {strides = array<i32>} : memref<16x1xf32, #tpu.memory_space<vmem>>, vector<16x1xf32>,
    %c0_13 = arith.constant 0 : index
    %c0_14 = arith.constant 0 : index
    %29 = vector.load %arg2[%c0_13, %c0_14] : memref<16x1xi32, #tpu.memory_space<vmem>>, vector<16x1xi32>
    %30 = vector.broadcast %29 : vector<16x1xi32> to vector<16x32xi32>
    %31 = arith.cmpi eq, %1, %30 : vector<16x32xi32>
    %cst_15 = arith.constant 0.000000e+00 : f32
    %32 = vector.broadcast %cst_15 : f32 to vector<16x32xf32>
    %33 = arith.select %31, %19, %32 : vector<16x32xi1>, vector<16x32xf32>
    %cst_16 = arith.constant dense<0.000000e+00> : vector<16xf32>
    %34 = vector.multi_reduction <add>, %33, %cst_16 [1] : vector<16x32xf32> to vector<16xf32>
    %35 = vector.shape_cast %34 : vector<16xf32> to vector<16x1xf32>
    %c0_17 = arith.constant 0 : index
    %c0_18 = arith.constant 0 : index
    %36 = vector.load %arg7[%c0_17, %c0_18] : memref<16x1xf32, #tpu.memory_space<vmem>>, vector<16x1xf32>
    tpu.vector_store %arg7[%c0_17, %c0_18], %35 {strides = array<i32>} : memref<16x1xf32, #tpu.memory_space<vmem>>, vector<16x1xf32>,
    return
  }
  func.func @transform_0(%arg0: i32) -> (i32, i32) {
    %c0_i32 = arith.constant 0 : i32
    %c0_i32_0 = arith.constant 0 : i32
    return %arg0, %c0_i32 : i32, i32
  }
  func.func @transform_1(%arg0: i32) -> (i32, i32) {
    %c0_i32 = arith.constant 0 : i32
    %c0_i32_0 = arith.constant 0 : i32
    return %arg0, %c0_i32 : i32, i32
  }
  func.func @transform_2(%arg0: i32) -> (i32, i32) {
    %c0_i32 = arith.constant 0 : i32
    %c0_i32_0 = arith.constant 0 : i32
    %c0_i32_1 = arith.constant 0 : i32
    return %c0_i32, %c0_i32_0 : i32, i32
  }
  func.func @transform_3(%arg0: i32) -> (i32, i32) {
    %c0_i32 = arith.constant 0 : i32
    %c0_i32_0 = arith.constant 0 : i32
    return %arg0, %c0_i32 : i32, i32
  }
  func.func @transform_4(%arg0: i32) -> (i32, i32) {
    %c0_i32 = arith.constant 0 : i32
    %c0_i32_0 = arith.constant 0 : i32
    return %arg0, %c0_i32 : i32, i32
  }
  func.func @transform_5(%arg0: i32) -> (i32, i32) {
    %c0_i32 = arith.constant 0 : i32
    %c0_i32_0 = arith.constant 0 : i32
    return %arg0, %c0_i32 : i32, i32
  }
  func.func @transform_6(%arg0: i32) -> (i32, i32) {
    %c0_i32 = arith.constant 0 : i32
    %c0_i32_0 = arith.constant 0 : i32
    return %arg0, %c0_i32 : i32, i32
  }
}

</mosaic_0001>

<bundles_post_ra>
// kernel: tpu_custom_call.1
= control target key start
LH: loop header
LB: loop body
LE: loop exit
PB: predicated region body
PF: predicated region fallthrough
CT: control target
= control target key end

     0   :  { %vm22_vm0 = vcmask 261120   ;;  %v159_v4 = vmov 0   ;;  %v20_v5 = vlaneseq  ;;  %vm63_vm7 = vcmask 7168   ;;  %s272_s0 = inlined_call_operand.vmem [shape: f32[16,32], index: 0, kind: input, shape index: {}]   ;;  %s273_s1 = inlined_call_operand.vmem [shape: s32[16,1], index: 1, kind: input, shape index: {}]   ;;  %s274_s2 = inlined_call_operand.vmem [shape: f32[1,32], index: 2, kind: input, shape index: {}]   ;;  %s275_s3 = inlined_call_operand.vmem [shape: s32[16,1], index: 3, kind: output, shape index: {0}]   ;;  %s276_s4 = inlined_call_operand.vmem [shape: f32[16,1], index: 4, kind: output, shape index: {1}]   ;;  %s277_s6 = inlined_call_operand.vmem [shape: f32[16,1], index: 6, kind: output, shape index: {3}]   ;;  %s278_s5 = inlined_call_operand.vmem [shape: f32[16,1], index: 5, kind: output, shape index: {2}]  }
   0x1   :  { %v198_v0 = vld [vmem:[%s272_s0] sm:$0xff]  ;;  %v203_v1 = vld [vmem:[%s272_s0 + $0x8] sm:$0xff]  ;;  %149 = vset.pattern.permute.xlu0 %v159_v4  ;;  %150 = vset.pattern.permute.xlu1 %v159_v4 }
   0x2   :  { %v23_v2 = vsel %vm22_vm0, %v198_v0, -inf  ;;  %v26_v3 = vsel %vm22_vm0, %v203_v1, -inf  ;;  %v209_v6 = vand.u32 127, %v20_v5  ;;  %v111_v25 = vld [vmem:[%s273_s1] sm:$0xff]  ;;  %v112_v26 = vld [vmem:[%s273_s1 + $0x8] sm:$0xff] }
   0x3   :  { %24 = vmax.xlane.f32.xlu0 %v23_v2  ;;  %v147_v49 = vld [vmem:[%s274_s2] ss:$0 sm:$0xff] }
   0x7   :  { %27 = vmax.xlane.f32.xlu0 %v26_v3 }
  0x90   :  { %v25_v7 = vpop.xlane.xlu0 %24 }
  0x91   :  { %vm29_vm1 = vcmp.eq.f32.partialorder %v198_v0, %v25_v7  ;;  %v66_v8 = vsub.f32 %v198_v0, %v25_v7 }
  0x92   :  { %v31_v9 = vsel %vm29_vm1, %v209_v6, 32 }
  0x93   :  { %v68_v10 = vmul.f32 1.442695, %v66_v8  ;;  %v33_v11 = vsel %vm22_vm0, %v31_v9, 2147483647 }
  0x94   :  { %v28_v12 = vpop.xlane.xlu0 %27  ;;  %v35_v13 = vshra.s32 %v33_v11, 16  ;;  %v34_v27 = vand.u32 65535, %v33_v11 }
  0x95   :  { %151 = vpow2.f32 %v68_v10  ;;  %vm30_vm2 = vcmp.eq.f32.partialorder %v203_v1, %v28_v12  ;;  %v67_v14 = vsub.f32 %v203_v1, %v28_v12 }
  0x96   :  { %v37_v15 = vcvt.s32.f32 %v35_v13  ;;  %v32_v16 = vsel %vm30_vm2, %v209_v6, 32  ;;  %v36_v29 = vcvt.s32.f32 %v34_v27 }
  0x97   :  { %v70_v17 = vmul.f32 1.442695, %v67_v14  ;;  %v48_v18 = vsel %vm22_vm0, %v32_v16, 2147483647 }
  0x98   :  { %38 = vmin.xlane.f32.xlu0 %v37_v15  ;;  %v50_v19 = vshra.s32 %v48_v18, 16  ;;  %v49_v30 = vand.u32 65535, %v48_v18 }
  0x99   :  { %153 = vpow2.f32 %v70_v17 }
  0x9a   :  { %v52_v20 = vcvt.s32.f32 %v50_v19  ;;  %v51_v33 = vcvt.s32.f32 %v49_v30 }
  0x9c   :  { %53 = vmin.xlane.f32.xlu1 %v52_v20 }
  0x9f   :  { %v152_v21 = vpop.eup %151 }
  0xa0   :  { %v72_v22 = vsel %vm22_vm0, %v152_v21, 0.0 }
  0xa1   :  { %73 = vadd.xlane.f32.xlu1 %v72_v22 }
  0xa3   :  { %v154_v23 = vpop.eup %153 }
  0xa4   :  { %v75_v24 = vsel %vm22_vm0, %v154_v23, 0.0 }
  0xa5   :  { %76 = vadd.xlane.f32.xlu1 %v75_v24 }
  0xae   :  { %114 = vperm.xlu0 %149, %v111_v25  }
  0xb6   :  { %117 = vperm.xlu1 %150, %v112_v26  }
 0x125   :  { %v39_v28 = vpop.xlane.xlu0 %38 }
 0x126   :  { %vm40_vm3 = vcmp.eq.f32.partialorder %v37_v15, %v39_v28  ;;  %v45_v58 = vcvt.f32.s32 %v39_v28 }
 0x127   :  { %v41_v31 = vsel %vm40_vm3, %v36_v29, inf }
 0x128   :  { %42 = vmin.xlane.f32.xlu1 %v41_v31  ;;  %v46_v60 = vshll.u32 %v45_v58, 16 }
 0x129   :  { %v54_v32 = vpop.xlane.xlu1 %53 }
 0x12a   :  { %vm55_vm4 = vcmp.eq.f32.partialorder %v52_v20, %v54_v32  ;;  %v60_v61 = vcvt.f32.s32 %v54_v32 }
 0x12b   :  { %v56_v34 = vsel %vm55_vm4, %v51_v33, inf }
 0x12c   :  { %57 = vmin.xlane.f32.xlu0 %v56_v34 }
 0x12d   :  { %v115_v43 = vpop.permute.xlu0 %114 }
 0x12e   :  { %v74_v35 = vpop.xlane.xlu1 %73  ;;  %vm119_vm5 = vcmp.eq.s32.totalorder %v209_v6, %v115_v43 }
 0x12f   :  { %155 = vlog2.f32 %v74_v35 }
 0x132   :  { %v77_v36 = vpop.xlane.xlu1 %76 }
 0x133   :  { %157 = vlog2.f32 %v77_v36 }
 0x136   :  { %v118_v52 = vpop.permute.xlu1 %117 }
 0x137   :  { %vm120_vm6 = vcmp.eq.s32.totalorder %v209_v6, %v118_v52 }
 0x139   :  { %v156_v37 = vpop.eup %155 }
 0x13a   :  { %v79_v38 = vmul.f32 0.6931472, %v156_v37 }
 0x13c   :  { %v82_v39 = vadd.f32 %v79_v38, %v25_v7 }
 0x13d   :  { %v158_v40 = vpop.eup %157 }
 0x13e   :  { %v81_v41 = vmul.f32 0.6931472, %v158_v40  ;;  %v84_v42 = vsub.f32 %v198_v0, %v82_v39 }
 0x140   :  { %v83_v44 = vadd.f32 %v81_v41, %v28_v12  ;;  %v86_v45 = vsel %vm22_vm0, %v84_v42, 0.0  ;;  %v121_v48 = vsel %vm119_vm5, %v84_v42, 0.0  ;;  %v101_v51 = vmul.f32 %v147_v49, %v84_v42 }
 0x141   :  { %87 = vadd.xlane.f32.xlu1 %v86_v45  ;;  %v123_v50 = vsel %vm22_vm0, %v121_v48, 0.0 }
 0x142   :  { %v85_v46 = vsub.f32 %v203_v1, %v83_v44  ;;  %v103_v53 = vsel %vm22_vm0, %v101_v51, 0.0  ;;  %v61_v1 = vshll.u32 %v60_v61, 16 }
 0x144   :  { %v89_v47 = vsel %vm22_vm0, %v85_v46, 0.0  ;;  %v102_v54 = vmul.f32 %v147_v49, %v85_v46  ;;  %v122_v56 = vsel %vm120_vm6, %v85_v46, 0.0 }
 0x145   :  { %90 = vadd.xlane.f32.xlu1 %v89_v47  ;;  %v126_v57 = vsel %vm22_vm0, %v122_v56, 0.0 }
 0x146   :  { %v106_v55 = vsel %vm22_vm0, %v102_v54, 0.0 }
 0x149   :  { %124 = vadd.xlane.f32.xlu1 %v123_v50 }
 0x14d   :  { %104 = vadd.xlane.f32.xlu1 %v103_v53 }
 0x151   :  { %107 = vadd.xlane.f32.xlu1 %v106_v55 }
 0x155   :  { %127 = vadd.xlane.f32.xlu1 %v126_v57 }
 0x1b5   :  { %v43_v59 = vpop.xlane.xlu1 %42 }
 0x1b6   :  { %v44_v62 = vcvt.f32.s32 %v43_v59 }
 0x1b8   :  { %v47_v63 = vadd.s32 %v46_v60, %v44_v62 }
 0x1b9   :  { %v58_v0 = vpop.xlane.xlu0 %57 }
 0x1ba   :  { %64 = vst.msk [vmem:[%s275_s3] sm:$0xff] %vm63_vm7, %v47_v63  ;;  %v59_v2 = vcvt.f32.s32 %v58_v0 }
 0x1bc   :  { %v62_v3 = vadd.s32 %v61_v1, %v59_v2 }
 0x1be   :  { %65 = vst.msk [vmem:[%s275_s3 + $0x8] sm:$0xff] %vm63_vm7, %v62_v3 }
 0x1ce   :  { %v88_v4 = vpop.xlane.xlu1 %87 }
 0x1cf   :  { %92 = vst.msk [vmem:[%s276_s4] sm:$0xff] %vm63_vm7, %v88_v4 }
 0x1d2   :  { %v91_v5 = vpop.xlane.xlu1 %90 }
 0x1d3   :  { %93 = vst.msk [vmem:[%s276_s4 + $0x8] sm:$0xff] %vm63_vm7, %v91_v5 }
 0x1d6   :  { %v125_v6 = vpop.xlane.xlu1 %124 }
 0x1d7   :  { %129 = vst.msk [vmem:[%s277_s6] sm:$0xff] %vm63_vm7, %v125_v6 }
 0x1da   :  { %v105_v7 = vpop.xlane.xlu1 %104 }
 0x1db   :  { %109 = vst.msk [vmem:[%s278_s5] sm:$0xff] %vm63_vm7, %v105_v7 }
 0x1de   :  { %v108_v8 = vpop.xlane.xlu1 %107 }
 0x1df   :  { %110 = vst.msk [vmem:[%s278_s5 + $0x8] sm:$0xff] %vm63_vm7, %v108_v8 }
 0x1e2   :  { %v128_v9 = vpop.xlane.xlu1 %127 }
 0x1e3   :  { %130 = vst.msk [vmem:[%s277_s6 + $0x8] sm:$0xff] %vm63_vm7, %v128_v9 }

</bundles_post_ra>
